<compile_context>
chip_gen: v7x
topology: tpu7x:2x2x1
jax: 0.10.0
libtpu: 0.0.40
codegen_flags: <defaults>
</compile_context>

<pallas_src>
import functools
import math

import jax
import jax.numpy as jnp
from jax.experimental import pallas as pl
from jax.experimental.pallas import tpu as pltpu


def _policy_kernel(s_ref, w1_ref, b1_ref, wh_ref, bh_ref, out_ref, *, action_dim):
    # Hidden layer: MXU dot (operands may be bf16), f32 accumulation,
    # bias add + relu in f32 on the VPU.
    x = jnp.dot(s_ref[...], w1_ref[...], preferred_element_type=jnp.float32)
    x = jnp.maximum(x + b1_ref[...], 0.0)

    # Fused heads: one [hidden, 2*action_dim] dot whose columns are (mu || std).
    heads = jnp.dot(x.astype(wh_ref.dtype), wh_ref[...],
                    preferred_element_type=jnp.float32) + bh_ref[...]

    # Lane-wise select between the two activations: avoids narrow lane slices /
    # concatenates and emits a single lane-contiguous output slab.
    col = jax.lax.broadcasted_iota(jnp.int32, heads.shape, dimension=1)
    mu_part = 2.0 * jnp.tanh(heads)
    # stable softplus: max(z, 0) + log1p(exp(-|z|))
    std_part = jnp.maximum(heads, 0.0) + jnp.log1p(jnp.exp(-jnp.abs(heads)))
    out_ref[...] = jnp.where(col < action_dim, mu_part, std_part)


def policy_continuous_forward(state, params, *, compute_dtype=jnp.bfloat16,
                              block_b=512):
    """state: [B, state_dim] float32. params: dict of weights/biases.

    compute_dtype: dtype of the MXU operands (bf16 recommended on v6e/v7x,
    also fine on v5e's MXU).  All non-matmul math stays f32.
    """
    w1, b1 = params["w1"], params["b1"]
    wmu, bmu = params["wmu"], params["bmu"]
    wstd, bstd = params["wstd"], params["bstd"]

    B, state_dim = state.shape
    hidden_dim = w1.shape[1]
    action_dim = wmu.shape[1]
    out_dim = 2 * action_dim

    # Fuse the two tiny heads into one weight / one bias (mu columns first).
    w_heads = jnp.concatenate([wmu, wstd], axis=1)                       # [H, 2A]
    b_heads = jnp.concatenate([bmu, bstd], axis=1).astype(jnp.float32)   # [1, 2A]

    # Cast MXU operands once here (halves state/weight DMA bytes for bf16).
    s_in = state.astype(compute_dtype)
    w1_in = w1.astype(compute_dtype)
    wh_in = w_heads.astype(compute_dtype)
    b1_in = b1.astype(jnp.float32)

    # Batch tile: full batch for small B, otherwise 512-row tiles (multiple of
    # 8/16 sublanes, comfortably inside v7x's 64 MiB VMEM with double-buffering).
    tb = B if B <= block_b else block_b
    grid = (pl.cdiv(B, tb),)

    batch_map = lambda i: (i, 0)
    const_map = lambda i: (0, 0)

    itemsize = jnp.dtype(compute_dtype).itemsize
    cost = pl.CostEstimate(
        flops=2 * B * (state_dim * hidden_dim + hidden_dim * out_dim),
        transcendentals=3 * B * out_dim,  # tanh + exp + log1p per output lane
        bytes_accessed=(B * state_dim * itemsize
                        + (state_dim * hidden_dim + hidden_dim * out_dim) * itemsize
                        + (hidden_dim + out_dim) * 4
                        + B * out_dim * 4),
    )

    out = pl.pallas_call(
        functools.partial(_policy_kernel, action_dim=action_dim),
        grid=grid,
        in_specs=[
            pl.BlockSpec((tb, state_dim), batch_map),          # state tile
            pl.BlockSpec((state_dim, hidden_dim), const_map),  # W1 (resident)
            pl.BlockSpec((1, hidden_dim), const_map),          # b1
            pl.BlockSpec((hidden_dim, out_dim), const_map),    # fused head W
            pl.BlockSpec((1, out_dim), const_map),             # fused head b
        ],
        out_specs=pl.BlockSpec((tb, out_dim), batch_map),
        out_shape=jax.ShapeDtypeStruct((B, out_dim), jnp.float32),
        compiler_params=pltpu.CompilerParams(
            dimension_semantics=("parallel",)),
        cost_estimate=cost,
    )(s_in, w1_in, b1_in, wh_in, b_heads)

    mu = out[:, :action_dim]
    std = out[:, action_dim:]
    return mu, std


def init_params(key, state_dim, hidden_dim, action_dim):
    """Deterministic init mimicking nn.Linear default (uniform +/- 1/sqrt(fan_in))."""
    ks = jax.random.split(key, 6)

    def linear(kw, kb, fan_in, fan_out):
        bound = 1.0 / math.sqrt(fan_in)
        w = jax.random.uniform(kw, (fan_in, fan_out), jnp.float32, -bound, bound)
        b = jax.random.uniform(kb, (1, fan_out), jnp.float32, -bound, bound)
        return w, b

    w1, b1 = linear(ks[0], ks[1], state_dim, hidden_dim)
    wmu, bmu = linear(ks[2], ks[3], hidden_dim, action_dim)
    wstd, bstd = linear(ks[4], ks[5], hidden_dim, action_dim)
    return dict(w1=w1, b1=b1, wmu=wmu, bmu=bmu, wstd=wstd, bstd=bstd)


def reference_forward(state, params):
    x = jnp.maximum(state @ params["w1"] + params["b1"], 0.0)
    mu = 2.0 * jnp.tanh(x @ params["wmu"] + params["bmu"])
    std = jax.nn.softplus(x @ params["wstd"] + params["bstd"])
    return mu, std


if __name__ == "__main__":
    B, STATE_DIM, HIDDEN_DIM, ACTION_DIM = 2, 4, 32, 2
    # TODO(synk): hidden_dim=32 / action_dim=2 leave most of the 128-lane vregs
    # as padding; widen hidden_dim to 128 in the model config if permissible.

    key = jax.random.PRNGKey(0)
    k_state, k_params = jax.random.split(key)

    state = jax.random.normal(k_state, (B, STATE_DIM), jnp.float32)
    params = init_params(k_params, STATE_DIM, HIDDEN_DIM, ACTION_DIM)

    mu_ref, std_ref = reference_forward(state, params)

    # Exact-precision path (f32 MXU operands): must match reference tightly.
    fwd_f32 = jax.jit(functools.partial(policy_continuous_forward,
                                        compute_dtype=jnp.float32))
    mu32, std32 = fwd_f32(state, params)
    jax.block_until_ready((mu32, std32))
    assert mu32.shape == (B, ACTION_DIM) and std32.shape == (B, ACTION_DIM)
    assert jnp.allclose(mu32, mu_ref, atol=1e-5, rtol=1e-5)
    assert jnp.allclose(std32, std_ref, atol=1e-5, rtol=1e-5)

    # Default fast path (bf16 MXU operands, f32 accumulation + activations).
    fwd = jax.jit(policy_continuous_forward)
    mu, std = fwd(state, params)
    jax.block_until_ready((mu, std))
    assert mu.shape == (B, ACTION_DIM) and std.shape == (B, ACTION_DIM)
    assert jnp.allclose(mu, mu_ref, atol=1e-1, rtol=1e-1)
    assert jnp.allclose(std, std_ref, atol=1e-1, rtol=1e-1)
    assert bool(jnp.all(std > 0.0))
    assert bool(jnp.all(std32 > 0.0))

    print("KERNEL_OK")
</pallas_src>

<mosaic_0001>
module attributes {stable_mosaic.version = 11 : i64} {
  func.func @_policy_kernel(%arg0: i32, %arg1: memref<2x4xf32, #tpu.memory_space<vmem>>, %arg2: memref<4x32xf32, #tpu.memory_space<vmem>>, %arg3: memref<1x32xf32, #tpu.memory_space<vmem>>, %arg4: memref<32x4xf32, #tpu.memory_space<vmem>>, %arg5: memref<1x4xf32, #tpu.memory_space<vmem>>, %arg6: memref<2x4xf32, #tpu.memory_space<vmem>>) attributes {dimension_semantics = [#tpu.dimension_semantics<parallel>], iteration_bounds = array<i64: 1>, scalar_prefetch = 0 : i64, scratch_operands = 0 : i64, tpu.core_type = #tpu.core_type<tc>, window_params = [{transform_indices = @transform_0, window_bounds = array<i64: 2, 4>}, {pipeline_mode = #tpu.pipeline_mode<synchronous>, transform_indices = @transform_1, window_bounds = array<i64: 4, 32>}, {pipeline_mode = #tpu.pipeline_mode<synchronous>, transform_indices = @transform_2, window_bounds = array<i64: 1, 32>}, {pipeline_mode = #tpu.pipeline_mode<synchronous>, transform_indices = @transform_3, window_bounds = array<i64: 32, 4>}, {pipeline_mode = #tpu.pipeline_mode<synchronous>, transform_indices = @transform_4, window_bounds = array<i64: 1, 4>}, {transform_indices = @transform_5, window_bounds = array<i64: 2, 4>}]} {
    %c0 = arith.constant 0 : index
    %c0_0 = arith.constant 0 : index
    %0 = vector.load %arg1[%c0, %c0_0] : memref<2x4xf32, #tpu.memory_space<vmem>>, vector<2x4xf32>
    %c0_1 = arith.constant 0 : index
    %c0_2 = arith.constant 0 : index
    %1 = vector.load %arg2[%c0_1, %c0_2] : memref<4x32xf32, #tpu.memory_space<vmem>>, vector<4x32xf32>
    %cst = arith.constant dense<0.000000e+00> : vector<2x32xf32>
    %2 = tpu.matmul %0, %1, %cst {dimension_numbers = #tpu.dot_dimension_numbers<[1], [0], [0], [1], [0, 0, 1, 1], [], []>} : vector<2x4xf32>, vector<4x32xf32>, vector<2x32xf32> -> vector<2x32xf32>
    %c0_3 = arith.constant 0 : index
    %c0_4 = arith.constant 0 : index
    %3 = vector.load %arg3[%c0_3, %c0_4] : memref<1x32xf32, #tpu.memory_space<vmem>>, vector<1x32xf32>
    %4 = vector.broadcast %3 : vector<1x32xf32> to vector<2x32xf32>
    %5 = arith.addf %2, %4 : vector<2x32xf32>
    %cst_5 = arith.constant 0.000000e+00 : f32
    %6 = vector.broadcast %cst_5 : f32 to vector<2x32xf32>
    %7 = arith.maximumf %5, %6 : vector<2x32xf32>
    %c0_6 = arith.constant 0 : index
    %c0_7 = arith.constant 0 : index
    %8 = vector.load %arg4[%c0_6, %c0_7] : memref<32x4xf32, #tpu.memory_space<vmem>>, vector<32x4xf32>
    %cst_8 = arith.constant dense<0.000000e+00> : vector<2x4xf32>
    %9 = tpu.matmul %7, %8, %cst_8 {dimension_numbers = #tpu.dot_dimension_numbers<[1], [0], [0], [1], [0, 0, 1, 1], [], []>} : vector<2x32xf32>, vector<32x4xf32>, vector<2x4xf32> -> vector<2x4xf32>
    %c0_9 = arith.constant 0 : index
    %c0_10 = arith.constant 0 : index
    %10 = vector.load %arg5[%c0_9, %c0_10] : memref<1x4xf32, #tpu.memory_space<vmem>>, vector<1x4xf32>
    %11 = vector.broadcast %10 : vector<1x4xf32> to vector<2x4xf32>
    %12 = arith.addf %9, %11 : vector<2x4xf32>
    %13 = tpu.iota {dimensions = array<i32: 1>} : vector<2x4xi32>
    %14 = math.tanh %12 : vector<2x4xf32>
    %cst_11 = arith.constant 2.000000e+00 : f32
    %15 = vector.broadcast %cst_11 : f32 to vector<2x4xf32>
    %16 = arith.mulf %15, %14 : vector<2x4xf32>
    %cst_12 = arith.constant 0.000000e+00 : f32
    %17 = vector.broadcast %cst_12 : f32 to vector<2x4xf32>
    %18 = arith.maximumf %12, %17 : vector<2x4xf32>
    %19 = math.absf %12 : vector<2x4xf32>
    %cst_13 = arith.constant 0.000000e+00 : f32
    %20 = vector.broadcast %cst_13 : f32 to vector<2x4xf32>
    %21 = arith.subf %20, %19 : vector<2x4xf32>
    %22 = math.exp %21 : vector<2x4xf32>
    %23 = math.log1p %22 : vector<2x4xf32>
    %24 = arith.addf %18, %23 : vector<2x4xf32>
    %c2_i32 = arith.constant 2 : i32
    %25 = vector.broadcast %c2_i32 : i32 to vector<2x4xi32>
    %26 = arith.cmpi slt, %13, %25 : vector<2x4xi32>
    %27 = arith.select %26, %16, %24 : vector<2x4xi1>, vector<2x4xf32>
    %c0_14 = arith.constant 0 : index
    %c0_15 = arith.constant 0 : index
    %28 = vector.load %arg6[%c0_14, %c0_15] : memref<2x4xf32, #tpu.memory_space<vmem>>, vector<2x4xf32>
    tpu.vector_store %arg6[%c0_14, %c0_15], %27 {strides = array<i32>} : memref<2x4xf32, #tpu.memory_space<vmem>>, vector<2x4xf32>,
    return
  }
  func.func @transform_0(%arg0: i32) -> (i32, i32) {
    %c0_i32 = arith.constant 0 : i32
    %c0_i32_0 = arith.constant 0 : i32
    return %arg0, %c0_i32 : i32, i32
  }
  func.func @transform_1(%arg0: i32) -> (i32, i32) {
    %c0_i32 = arith.constant 0 : i32
    %c0_i32_0 = arith.constant 0 : i32
    %c0_i32_1 = arith.constant 0 : i32
    return %c0_i32, %c0_i32_0 : i32, i32
  }
  func.func @transform_2(%arg0: i32) -> (i32, i32) {
    %c0_i32 = arith.constant 0 : i32
    %c0_i32_0 = arith.constant 0 : i32
    %c0_i32_1 = arith.constant 0 : i32
    return %c0_i32, %c0_i32_0 : i32, i32
  }
  func.func @transform_3(%arg0: i32) -> (i32, i32) {
    %c0_i32 = arith.constant 0 : i32
    %c0_i32_0 = arith.constant 0 : i32
    %c0_i32_1 = arith.constant 0 : i32
    return %c0_i32, %c0_i32_0 : i32, i32
  }
  func.func @transform_4(%arg0: i32) -> (i32, i32) {
    %c0_i32 = arith.constant 0 : i32
    %c0_i32_0 = arith.constant 0 : i32
    %c0_i32_1 = arith.constant 0 : i32
    return %c0_i32, %c0_i32_0 : i32, i32
  }
  func.func @transform_5(%arg0: i32) -> (i32, i32) {
    %c0_i32 = arith.constant 0 : i32
    %c0_i32_0 = arith.constant 0 : i32
    return %arg0, %c0_i32 : i32, i32
  }
}

</mosaic_0001>

<bundles_post_ra>
// kernel: policy_continuous_forward.1
= control target key start
LH: loop header
LB: loop body
LE: loop exit
PB: predicated region body
PF: predicated region fallthrough
CT: control target
= control target key end

     0   :  { %vm33_vm0 = vcmask 1043456   ;;  %vm29_vm1 = vcmask 31744   ;;  %v263_v0 = vmov 0.0   ;;  %vm264_vm2 = vmmov 0   ;;  %s323_s1 = inlined_call_operand.vmem [shape: f32[4,32], index: 1, kind: input, shape index: {}]   ;;  %s324_s0 = inlined_call_operand.vmem [shape: f32[2,4], index: 0, kind: input, shape index: {}]   ;;  %s325_s3 = inlined_call_operand.vmem [shape: f32[32,4], index: 3, kind: input, shape index: {}]   ;;  %s326_s2 = inlined_call_operand.vmem [shape: f32[1,32], index: 2, kind: input, shape index: {}]   ;;  %s327_s4 = inlined_call_operand.vmem [shape: f32[1,4], index: 4, kind: input, shape index: {}]   ;;  %s328_s5 = inlined_call_operand.vmem [shape: f32[2,4], index: 5, kind: output, shape index: {}]  }
   0x1   :  { %232 = vmatprep.subr.mxu0 %v263_v0  ;;  %v21_v1 = vld [vmem:[%s323_s1] sm:$0xf]  ;;  %234 = vmatprep.mubr.msk.f32.mxu0 %vm264_vm2, %v263_v0  ;;  %v265_v4 = vmov 0.0|0.0   ;;  %v109_v5 = vld [vmem:[%s325_s3 + $0x8] sm:$0xff]  ;;  %v110_v7 = vld [vmem:[%s325_s3 + $0x10] sm:$0xff]  ;;  %vm119_vm3 = vcmask 261120   ;;  %v193_v25 = vlaneseq }
   0x2   :  { %v20_v2 = vld [vmem:[%s324_s0] sm:$0x3]  ;;  %233 = vmatpush3.msk.msra.mxu0 %vm33_vm0, %v21_v1  ;;  %248 = vmatprep.subr.bf16.mxu1 %v265_v4  ;;  %v111_v8 = vld [vmem:[%s325_s3 + $0x18] sm:$0xff]  ;;  %vm214_vm6 = vcmask 25600  }
   0x3   :  { %v108_v3 = vld [vmem:[%s325_s3] sm:$0xff]  ;;  %235 = vmatmul.mubr.msk.f32.vlgmr.msra.gmra.mrb[0].mxu0 %vm29_vm1, %v20_v2  ;;  %245 = vmatprep.mubr.msk.f32.mxu1 %vm264_vm2, %v263_v0  ;;  %v252_v9 = vpack.c.bf16 %v111_v8, %v110_v7  ;;  %v194_v28 = vand.u32 127, %v193_v25 }
   0x4   :  { %v249_v6 = vpack.c.bf16 %v109_v5, %v108_v3  ;;  %v220_v10 = vld [vmem:[%s326_s2] ss:$0 sm:$0xff] }
   0x5   :  { %v223_v15 = vld [vmem:[%s327_s4] ss:$0 sm:$0xff]  ;;  %vm212_vm5 = vcmp.lt.s32.totalorder %v194_v28, 2 }
   0x6   :  { %250 = vmatpush3.bf16.msra.mxu1 %v249_v6 }
   0x7   :  { %251 = vmatprep.subr.bf16.mxu1 %v265_v4 }
   0xa   :  { %253 = vmatpush3.bf16.msra.mxu1 %v252_v9 }
  0xd6   :  { %v103_v11 = vpop.f32.mrb[0].mxu0 }
  0xd7   :  { %v104_v12 = vadd.f32 %v220_v10, %v103_v11  ;;  %v236_v13 = vpop.f32.mrb[1].mxu0 }
  0xd9   :  { %v107_v14 = vmax.f32 %v104_v12, 0.0 }
  0xdb   :  { %246 = vmatmul.mubr.msk.f32.vlgmr.msra.gmra.mrb[0].mxu1 %vm119_vm3, %v107_v14 }
 0x1ae   :  { %v189_v16 = vpop.f32.mrb[0].mxu1 }
 0x1af   :  { %v190_v17 = vadd.f32 %v223_v15, %v189_v16  ;;  %v247_v18 = vpop.f32.mrb[1].mxu1 }
 0x1b1   :  { %v198_v19 = vand.u32 2147483647, %v190_v17  ;;  %v197_v33 = vmax.f32 %v190_v17, 0.0 }
 0x1b3   :  { %v199_v20 = vsub.f32 0.0, %v198_v19 }
 0x1b5   :  { %v200_v21 = vmul.f32 1.442695, %v199_v20 }
 0x1b7   :  { %257 = vpow2.f32 %v200_v21 }
 0x1c1   :  { %v258_v22 = vpop.eup %257 }
 0x1c2   :  { %v202_v23 = vadd.f32 1.0, %v258_v22  ;;  %v205_v24 = vmul.f32 -0.5, %v258_v22  ;;  %v208_v27 = vand.u32 2147483647, %v258_v22 }
 0x1c4   :  { %259 = vlog2.f32 %v202_v23  ;;  %v206_v26 = vadd.f32 1.0, %v205_v24  ;;  %vm209_vm4 = vcmp.lt.f32.partialorder %v208_v27, 0.0004427343 }
 0x1c5   :  { %261 = vtanh.f32 %v190_v17 }
 0x1c6   :  { %v207_v32 = vmul.f32 %v258_v22, %v206_v26 }
 0x1ce   :  { %v260_v29 = vpop.eup %259 }
 0x1cf   :  { %v262_v30 = vpop.eup %261  ;;  %v204_v31 = vmul.f32 0.6931472, %v260_v29 }
 0x1d0   :  { %v196_v35 = vmul.f32 2.0, %v262_v30 }
 0x1d1   :  { %v210_v34 = vsel %vm209_vm4, %v207_v32, %v204_v31 }
 0x1d2   :  { %v211_v36 = vadd.f32 %v210_v34, %v197_v33 }
 0x1d4   :  { %v213_v37 = vsel %vm212_vm5, %v196_v35, %v211_v36 }
 0x1d5   :  { %215 = vst.msk [vmem:[%s328_s5] sm:$0x3] %vm214_vm6, %v213_v37 }

</bundles_post_ra>
